<compile_context>
chip_gen: v5e
topology: v5e:2x2
jax: 0.10.0
libtpu: 0.0.40
codegen_flags: <defaults>
</compile_context>

<pallas_src>
import jax
import jax.numpy as jnp
from jax.experimental import pallas as pl
from jax.experimental.pallas import tpu as pltpu


def _round_up(x, m):
    return ((x + m - 1) // m) * m


def _cdiv(a, b):
    return -(-a // b)


def _vmem_capacity_bytes():
    try:
        return int(pltpu.get_tpu_info().vmem_capacity_bytes)
    except Exception:
        return 64 * 1024 * 1024  # conservative (v7x-sized) fallback


def _invariant_spec(shape):
    """Grid-invariant operand: single-buffered when the runtime supports it."""
    idx = lambda i, k: (0,) * len(shape)
    try:
        return pl.BlockSpec(shape, idx, pipeline_mode=pl.Buffered(1))
    except TypeError:
        return pl.BlockSpec(shape, idx)


def _plan_tiles(n, k_width, vmem_cap):
    """Pick (tm, tk, n_rows, n_cols): row tile (mult of 32), contraction tile
    (mult of 128) and the padded adjacency shape, sized per-generation."""
    big = vmem_cap >= 96 * 1024 * 1024          # v5e / v6e (128 MiB) vs v7x (64 MiB)
    tm_cap = 512 if big else 256
    a_budget = (16 if big else 8) * 1024 * 1024   # int8 bytes per A buffer
    o_budget = (8 if big else 4) * 1024 * 1024    # bf16 bytes per contraction-operand buffer

    kw = max(k_width, 128)
    tk_cap = max(128, (o_budget // (2 * kw)) // 128 * 128)

    # near-equal split of the (128-aligned) contraction dim -> pad <= 128/chunk
    n128 = _round_up(n, 128)
    ksteps = _cdiv(n128, tk_cap)
    tk = _round_up(_cdiv(n128, ksteps), 128)
    n_cols = tk * ksteps

    tm_cap = max(32, min(tm_cap, (a_budget // tk) // 32 * 32))
    n32 = _round_up(n, 32)
    rsteps = _cdiv(n32, tm_cap)
    tm = _round_up(_cdiv(n32, rsteps), 32)
    n_rows = tm * rsteps
    return tm, tk, n_rows, n_cols


# ----------------------------- kernels ------------------------------------ #

def _gcn_layer1_fused_kernel(a_ref, xw_ref, b1_ref, w2tp_ref, z_ref, acc_ref):
    """acc += A_blk @ (X @ W1^T)_blk ; last k: z = relu(acc + b1) @ W2^T_pad."""
    @pl.when(pl.program_id(1) == 0)
    def _():
        acc_ref[...] = jnp.zeros_like(acc_ref)

    a = a_ref[...].astype(jnp.bfloat16)          # int8 0/1 -> bf16 (exact)
    acc_ref[...] += jnp.dot(a, xw_ref[...], preferred_element_type=jnp.float32)

    @pl.when(pl.program_id(1) == pl.num_programs(1) - 1)
    def _():
        h1 = jnp.maximum(acc_ref[...] + b1_ref[...], 0.0)       # bias+relu f32
        z = jnp.dot(h1.astype(jnp.bfloat16), w2tp_ref[...],
                    preferred_element_type=jnp.float32)
        z_ref[...] = z.astype(z_ref.dtype)


def _gcn_layer1_std_kernel(a_ref, x_ref, w1t_ref, b1_ref, w2tp_ref, z_ref, acc_ref):
    """acc += A_blk @ X_blk ; last k: z = relu(acc @ W1^T + b1) @ W2^T_pad."""
    @pl.when(pl.program_id(1) == 0)
    def _():
        acc_ref[...] = jnp.zeros_like(acc_ref)

    a = a_ref[...].astype(jnp.bfloat16)
    acc_ref[...] += jnp.dot(a, x_ref[...], preferred_element_type=jnp.float32)

    @pl.when(pl.program_id(1) == pl.num_programs(1) - 1)
    def _():
        h1 = jnp.dot(acc_ref[...].astype(jnp.bfloat16), w1t_ref[...],
                     preferred_element_type=jnp.float32) + b1_ref[...]
        h1 = jnp.maximum(h1, 0.0)
        z = jnp.dot(h1.astype(jnp.bfloat16), w2tp_ref[...],
                    preferred_element_type=jnp.float32)
        z_ref[...] = z.astype(z_ref.dtype)


def _gcn_layer2_kernel(a_ref, z_ref, b2_ref, o_ref):
    """o (f32, resident across k) = b2 + sum_k A_blk @ z_blk."""
    @pl.when(pl.program_id(1) == 0)
    def _():
        o_ref[...] = jnp.broadcast_to(b2_ref[...], o_ref.shape).astype(o_ref.dtype)

    a = a_ref[...].astype(jnp.bfloat16)
    o_ref[...] += jnp.dot(a, z_ref[...], preferred_element_type=jnp.float32)


# ----------------------------- wrapper ------------------------------------ #

def gcn_net_forward(adj, features, w1, b1, w2, b2):
    """
    adj:      (N, N)              dense adjacency, adj[dst, src] = 1 if edge src->dst
    features: (N, in_feats)
    w1:       (hidden, in_feats)  nn.Linear weight layout
    b1:       (hidden,)
    w2:       (num_classes, hidden)
    b2:       (num_classes,)
    returns:  (N, num_classes) float32
    """
    n, in_feats = features.shape
    hidden = w1.shape[0]
    num_classes = w2.shape[0]
    c_pad = _round_up(num_classes, 128)

    # Reassociate layer 1 only when it shrinks the N^2 matmul.
    reassociate = in_feats >= hidden
    k_width1 = hidden if reassociate else in_feats

    vmem_cap = _vmem_capacity_bytes()
    vmem_limit = min(vmem_cap * 3 // 4, 112 * 1024 * 1024)
    tm, tk, n_rows, n_cols = _plan_tiles(n, max(k_width1, c_pad), vmem_cap)

    cparams = pltpu.CompilerParams(
        dimension_semantics=("parallel", "arbitrary"),
        vmem_limit_bytes=int(vmem_limit),
    )

    # --- wrapper-side padding / dtype plumbing (zero-padded rows/cols of A keep
    #     the math exact).  a_i8 / xw depend only on (adj, features) and can be
    #     hoisted & cached when the graph is reused across calls. --------------
    a_i8 = jnp.zeros((n_rows, n_cols), jnp.int8).at[:n, :n].set(adj.astype(jnp.int8))
    w2tp = jnp.zeros((hidden, c_pad), jnp.bfloat16).at[:, :num_classes].set(
        jnp.transpose(w2).astype(jnp.bfloat16))
    b1r = b1.reshape(1, -1).astype(jnp.float32)
    b2p = jnp.zeros((1, c_pad), jnp.float32).at[:, :num_classes].set(
        b2.reshape(1, -1).astype(jnp.float32))

    grid = (n_rows // tm, n_cols // tk)
    a_spec = pl.BlockSpec((tm, tk), lambda i, k: (i, k))
    out_spec = pl.BlockSpec((tm, c_pad), lambda i, k: (i, 0))

    # ---- layer 1: aggregate + linear + relu, fused with the layer-2 weight ----
    if reassociate:
        xp = jnp.zeros((n_cols, in_feats), jnp.float32).at[:n].set(
            features.astype(jnp.float32))
        xw = jnp.dot(xp, jnp.transpose(w1).astype(jnp.float32)).astype(jnp.bfloat16)
        z = pl.pallas_call(
            _gcn_layer1_fused_kernel,
            out_shape=jax.ShapeDtypeStruct((n_rows, c_pad), jnp.bfloat16),
            grid=grid,
            in_specs=[a_spec,
                      pl.BlockSpec((tk, hidden), lambda i, k: (k, 0)),
                      _invariant_spec((1, hidden)),
                      _invariant_spec((hidden, c_pad))],
            out_specs=out_spec,
            scratch_shapes=[pltpu.VMEM((tm, hidden), jnp.float32)],
            compiler_params=cparams,
        )(a_i8, xw, b1r, w2tp)
    else:
        xp = jnp.zeros((n_cols, in_feats), jnp.bfloat16).at[:n].set(
            features.astype(jnp.bfloat16))
        w1t = jnp.transpose(w1).astype(jnp.bfloat16)
        z = pl.pallas_call(
            _gcn_layer1_std_kernel,
            out_shape=jax.ShapeDtypeStruct((n_rows, c_pad), jnp.bfloat16),
            grid=grid,
            in_specs=[a_spec,
                      pl.BlockSpec((tk, in_feats), lambda i, k: (k, 0)),
                      _invariant_spec((in_feats, hidden)),
                      _invariant_spec((1, hidden)),
                      _invariant_spec((hidden, c_pad))],
            out_specs=out_spec,
            scratch_shapes=[pltpu.VMEM((tm, in_feats), jnp.float32)],
            compiler_params=cparams,
        )(a_i8, xp, w1t, b1r, w2tp)

    # z (n_rows rows) feeds layer 2's contraction dim (n_cols rows).  Extra rows
    # of z beyond N only ever multiply zero columns of A, so this is exact.
    if n_rows > n_cols:
        z2 = z[:n_cols]
    elif n_rows < n_cols:
        z2 = jnp.zeros((n_cols, c_pad), z.dtype).at[:n_rows].set(z)
    else:
        z2 = z

    # ---- layer 2: aggregate of z + bias ----
    out_p = pl.pallas_call(
        _gcn_layer2_kernel,
        out_shape=jax.ShapeDtypeStruct((n_rows, c_pad), jnp.float32),
        grid=grid,
        in_specs=[a_spec,
                  pl.BlockSpec((tk, c_pad), lambda i, k: (k, 0)),
                  _invariant_spec((1, c_pad))],
        out_specs=out_spec,
        compiler_params=cparams,
    )(a_i8, z2, b2p)

    return out_p[:n, :num_classes]


def _reference(adj, features, w1, b1, w2, b2):
    """Pure-JAX f32 reference replicating the DGL/PyTorch semantics."""
    h = adj @ features
    h = h @ w1.T + b1
    h = jnp.maximum(h, 0.0)
    h = adj @ h
    return h @ w2.T + b2


if __name__ == "__main__":
    def run_case(n, in_feats, hidden, num_classes):
        key = jax.random.PRNGKey(0)
        k_adj, k_x, k_w1, k_b1, k_w2, k_b2 = jax.random.split(key, 6)

        # Deterministic random graph: ~30% edge density, dense adjacency matrix.
        adj = (jax.random.uniform(k_adj, (n, n)) < 0.3).astype(jnp.float32)
        features = jax.random.normal(k_x, (n, in_feats), dtype=jnp.float32)

        lim1 = 1.0 / (in_feats ** 0.5)
        w1 = jax.random.uniform(k_w1, (hidden, in_feats), minval=-lim1, maxval=lim1)
        b1 = jax.random.uniform(k_b1, (hidden,), minval=-lim1, maxval=lim1)
        lim2 = 1.0 / (hidden ** 0.5)
        w2 = jax.random.uniform(k_w2, (num_classes, hidden), minval=-lim2, maxval=lim2)
        b2 = jax.random.uniform(k_b2, (num_classes,), minval=-lim2, maxval=lim2)

        out = jax.block_until_ready(gcn_net_forward(adj, features, w1, b1, w2, b2))
        ref = _reference(adj, features, w1, b1, w2, b2)
        assert out.shape == (n, num_classes)
        # bf16 feeds to the MXU (f32 accumulation) -> tolerance sized for bf16.
        assert jnp.allclose(out, ref, atol=1e-1, rtol=5e-2), \
            float(jnp.max(jnp.abs(out - ref)))

    run_case(8, 16, 32, 8)     # in_feats < hidden  -> (A @ X) @ W1^T path
    run_case(50, 64, 16, 3)    # in_feats >= hidden -> A @ (X @ W1^T) path
    print("KERNEL_OK")
</pallas_src>

<mosaic_0001>
module attributes {stable_mosaic.version = 11 : i64} {
  func.func @_gcn_layer1_std_kernel(%arg0: i32, %arg1: i32, %arg2: memref<32x128xi8, #tpu.memory_space<vmem>>, %arg3: memref<128x16xbf16, #tpu.memory_space<vmem>>, %arg4: memref<16x32xbf16, #tpu.memory_space<vmem>>, %arg5: memref<1x32xf32, #tpu.memory_space<vmem>>, %arg6: memref<32x128xbf16, #tpu.memory_space<vmem>>, %arg7: memref<32x128xbf16, #tpu.memory_space<vmem>>, %arg8: memref<32x16xf32, #tpu.memory_space<vmem>>) attributes {dimension_semantics = [#tpu.dimension_semantics<parallel>, #tpu.dimension_semantics<arbitrary>], iteration_bounds = array<i64: 1, 1>, scalar_prefetch = 0 : i64, scratch_operands = 1 : i64, tpu.core_type = #tpu.core_type<tc>, window_params = [{transform_indices = @transform_0, window_bounds = array<i64: 32, 128>}, {transform_indices = @transform_1, window_bounds = array<i64: 128, 16>}, {pipeline_mode = #tpu.pipeline_mode<synchronous>, transform_indices = @transform_2, window_bounds = array<i64: 16, 32>}, {pipeline_mode = #tpu.pipeline_mode<synchronous>, transform_indices = @transform_3, window_bounds = array<i64: 1, 32>}, {pipeline_mode = #tpu.pipeline_mode<synchronous>, transform_indices = @transform_4, window_bounds = array<i64: 32, 128>}, {transform_indices = @transform_5, window_bounds = array<i64: 32, 128>}]} {
    %c0_i32 = arith.constant 0 : i32
    %0 = arith.cmpi eq, %arg1, %c0_i32 : i32
    %1 = arith.extui %0 : i1 to i32
    %c0_i32_0 = arith.constant 0 : i32
    %2 = arith.cmpi ne, %1, %c0_i32_0 : i32
    scf.if %2 {
      %cst_10 = arith.constant 0.000000e+00 : f32
      %13 = vector.broadcast %cst_10 : f32 to vector<32x16xf32>
      %c0_11 = arith.constant 0 : index
      %c0_12 = arith.constant 0 : index
      %14 = vector.load %arg8[%c0_11, %c0_12] : memref<32x16xf32, #tpu.memory_space<vmem>>, vector<32x16xf32>
      tpu.vector_store %arg8[%c0_11, %c0_12], %13 {strides = array<i32>} : memref<32x16xf32, #tpu.memory_space<vmem>>, vector<32x16xf32>,
    } else {
    }
    %c0 = arith.constant 0 : index
    %c0_1 = arith.constant 0 : index
    %3 = vector.load %arg2[%c0, %c0_1] : memref<32x128xi8, #tpu.memory_space<vmem>>, vector<32x128xi8>
    %4 = arith.sitofp %3 : vector<32x128xi8> to vector<32x128xbf16>
    %c0_2 = arith.constant 0 : index
    %c0_3 = arith.constant 0 : index
    %5 = vector.load %arg8[%c0_2, %c0_3] : memref<32x16xf32, #tpu.memory_space<vmem>>, vector<32x16xf32>
    %c0_4 = arith.constant 0 : index
    %c0_5 = arith.constant 0 : index
    %6 = vector.load %arg3[%c0_4, %c0_5] : memref<128x16xbf16, #tpu.memory_space<vmem>>, vector<128x16xbf16>
    %cst = arith.constant dense<0.000000e+00> : vector<32x16xf32>
    %7 = tpu.matmul %4, %6, %cst {dimension_numbers = #tpu.dot_dimension_numbers<[1], [0], [0], [1], [0, 0, 1, 1], [], []>} : vector<32x128xbf16>, vector<128x16xbf16>, vector<32x16xf32> -> vector<32x16xf32>
    %8 = arith.addf %5, %7 : vector<32x16xf32>
    %c0_6 = arith.constant 0 : index
    %c0_7 = arith.constant 0 : index
    %9 = vector.load %arg8[%c0_6, %c0_7] : memref<32x16xf32, #tpu.memory_space<vmem>>, vector<32x16xf32>
    tpu.vector_store %arg8[%c0_6, %c0_7], %8 {strides = array<i32>} : memref<32x16xf32, #tpu.memory_space<vmem>>, vector<32x16xf32>,
    %c0_i32_8 = arith.constant 0 : i32
    %10 = arith.cmpi eq, %arg1, %c0_i32_8 : i32
    %11 = arith.extui %10 : i1 to i32
    %c0_i32_9 = arith.constant 0 : i32
    %12 = arith.cmpi ne, %11, %c0_i32_9 : i32
    scf.if %12 {
      %c0_10 = arith.constant 0 : index
      %c0_11 = arith.constant 0 : index
      %13 = vector.load %arg8[%c0_10, %c0_11] : memref<32x16xf32, #tpu.memory_space<vmem>>, vector<32x16xf32>
      %14 = arith.truncf %13 : vector<32x16xf32> to vector<32x16xbf16>
      %c0_12 = arith.constant 0 : index
      %c0_13 = arith.constant 0 : index
      %15 = vector.load %arg4[%c0_12, %c0_13] : memref<16x32xbf16, #tpu.memory_space<vmem>>, vector<16x32xbf16>
      %cst_14 = arith.constant dense<0.000000e+00> : vector<32x32xf32>
      %16 = tpu.matmul %14, %15, %cst_14 {dimension_numbers = #tpu.dot_dimension_numbers<[1], [0], [0], [1], [0, 0, 1, 1], [], []>} : vector<32x16xbf16>, vector<16x32xbf16>, vector<32x32xf32> -> vector<32x32xf32>
      %c0_15 = arith.constant 0 : index
      %c0_16 = arith.constant 0 : index
      %17 = vector.load %arg5[%c0_15, %c0_16] : memref<1x32xf32, #tpu.memory_space<vmem>>, vector<1x32xf32>
      %18 = vector.broadcast %17 : vector<1x32xf32> to vector<32x32xf32>
      %19 = arith.addf %16, %18 : vector<32x32xf32>
      %cst_17 = arith.constant 0.000000e+00 : f32
      %20 = vector.broadcast %cst_17 : f32 to vector<32x32xf32>
      %21 = arith.maximumf %19, %20 : vector<32x32xf32>
      %22 = arith.truncf %21 : vector<32x32xf32> to vector<32x32xbf16>
      %c0_18 = arith.constant 0 : index
      %c0_19 = arith.constant 0 : index
      %23 = vector.load %arg6[%c0_18, %c0_19] : memref<32x128xbf16, #tpu.memory_space<vmem>>, vector<32x128xbf16>
      %cst_20 = arith.constant dense<0.000000e+00> : vector<32x128xf32>
      %24 = tpu.matmul %22, %23, %cst_20 {dimension_numbers = #tpu.dot_dimension_numbers<[1], [0], [0], [1], [0, 0, 1, 1], [], []>} : vector<32x32xbf16>, vector<32x128xbf16>, vector<32x128xf32> -> vector<32x128xf32>
      %25 = arith.truncf %24 : vector<32x128xf32> to vector<32x128xbf16>
      %c0_21 = arith.constant 0 : index
      %c0_22 = arith.constant 0 : index
      %26 = vector.load %arg7[%c0_21, %c0_22] : memref<32x128xbf16, #tpu.memory_space<vmem>>, vector<32x128xbf16>
      tpu.vector_store %arg7[%c0_21, %c0_22], %25 {strides = array<i32>} : memref<32x128xbf16, #tpu.memory_space<vmem>>, vector<32x128xbf16>,
    } else {
    }
    return
  }
  func.func @transform_0(%arg0: i32, %arg1: i32) -> (i32, i32) {
    %c0_i32 = arith.constant 0 : i32
    return %arg0, %arg1 : i32, i32
  }
  func.func @transform_1(%arg0: i32, %arg1: i32) -> (i32, i32) {
    %c0_i32 = arith.constant 0 : i32
    %c0_i32_0 = arith.constant 0 : i32
    return %arg1, %c0_i32 : i32, i32
  }
  func.func @transform_2(%arg0: i32, %arg1: i32) -> (i32, i32) {
    %c0_i32 = arith.constant 0 : i32
    %c0_i32_0 = arith.constant 0 : i32
    %c0_i32_1 = arith.constant 0 : i32
    return %c0_i32, %c0_i32_0 : i32, i32
  }
  func.func @transform_3(%arg0: i32, %arg1: i32) -> (i32, i32) {
    %c0_i32 = arith.constant 0 : i32
    %c0_i32_0 = arith.constant 0 : i32
    %c0_i32_1 = arith.constant 0 : i32
    return %c0_i32, %c0_i32_0 : i32, i32
  }
  func.func @transform_4(%arg0: i32, %arg1: i32) -> (i32, i32) {
    %c0_i32 = arith.constant 0 : i32
    %c0_i32_0 = arith.constant 0 : i32
    %c0_i32_1 = arith.constant 0 : i32
    return %c0_i32, %c0_i32_0 : i32, i32
  }
  func.func @transform_5(%arg0: i32, %arg1: i32) -> (i32, i32) {
    %c0_i32 = arith.constant 0 : i32
    %c0_i32_0 = arith.constant 0 : i32
    return %arg0, %c0_i32 : i32, i32
  }
}

</mosaic_0001>

<bundles_post_ra>
// kernel: tpu_custom_call.1
= control target key start
LH: loop header
LB: loop body
LE: loop exit
PB: predicated region body
PF: predicated region fallthrough
CT: control target
= control target key end

     0   :  { %vm26_vm0 = vcmask 130048   ;;  %v367_v2 = vmov 0.0   ;;  %s453_s0 = inlined_call_operand.vmem [shape: s8[32,128], index: 0, kind: input, shape index: {}]   ;;  %s454_s1 = inlined_call_operand.vmem [shape: bf16[128,16], index: 1, kind: input, shape index: {}]   ;;  %s455_s2 = inlined_call_operand.vmem [shape: bf16[16,32], index: 2, kind: input, shape index: {}]   ;;  %s456_s3 = inlined_call_operand.vmem [shape: f32[1,32], index: 3, kind: input, shape index: {}]   ;;  %s457_s4 = inlined_call_operand.vmem [shape: bf16[32,128], index: 4, kind: input, shape index: {}]   ;;  %s458_s5 = inlined_call_operand.hbm [shape: bf16[32,128], index: 5, kind: output, shape index: {}]  }
   0x1   :  { %v313_v0 = vld [vmem:[%s454_s1 + $0x38] sm:$0xff]  ;;  %v312_v1 = vld [vmem:[%s454_s1 + $0x30] sm:$0xff]  ;;  %27 = vst.msk [vmem:[#allocation2] sm:$0xff] %vm26_vm0, %v367_v2 }
   0x2   :  { %110 = vmatpush.bf16.msra.mxu0 %v313_v0  ;;  %328 = vmatpush.bf16.msra.mxu3 %v313_v0  ;;  %28 = vst.msk [vmem:[#allocation2 + $0x8] sm:$0xff] %vm26_vm0, %v367_v2 }
   0x3   :  { %10 = vsyncpa [#allocation4], 0  ;;  %29 = vst.msk [vmem:[#allocation2 + $0x10] sm:$0xff] %vm26_vm0, %v367_v2  ;;  %v311_v3 = vld [vmem:[%s454_s1 + $0x28] sm:$0xff]  ;;  %v310_v4 = vld [vmem:[%s454_s1 + $0x20] sm:$0xff]  ;;  %vm206_vm1 = vcmask 261120  }
   0x4   :  { %30 = vst.msk [vmem:[#allocation2 + $0x18] sm:$0xff] %vm26_vm0, %v367_v2  ;;  %v309_v5 = vld [vmem:[%s454_s1 + $0x18] sm:$0xff]  ;;  %v308_v6 = vld [vmem:[%s454_s1 + $0x10] sm:$0xff]  ;;  %v31_v7 = vld [vmem:[%s453_s0] sm:$0xff]  ;;  %s246_s18 = sshll.u32 %s458_s5, 4  ;;  %s369_s19 = smov 64   ;;  %s247_s18 = int_to_ptr.hbm [resolvable:$true] %s246_s18 }
   0x5   :  { %v32_v8 = vunpack.c.0.s8 %v31_v7  ;;  %v33_v9 = vunpack.c.1.s8 %v31_v7  ;;  %v34_v10 = vunpack.c.2.s8 %v31_v7  ;;  %v35_v11 = vunpack.c.3.s8 %v31_v7  ;;  %v307_v12 = vld [vmem:[%s454_s1 + $0x8] sm:$0xff]  ;;  %v306_v17 = vld [vmem:[%s454_s1] sm:$0xff]  ;;  %s370_s20 = smov 4  }
   0x6   :  { %111 = vmatpush.bf16.msra.mxu0 %v312_v1  ;;  %329 = vmatpush.bf16.msra.mxu3 %v312_v1  ;;  %v314_v20 = vld [vmem:[%s455_s2] sm:$0xff]  ;;  %v316_v39 = vld [vmem:[%s457_s4 + $0x8] sm:$0xff] }
   0x7   :  { %v36_v13 = vcvt.s32.f32 %v32_v8  ;;  %v37_v14 = vcvt.s32.f32 %v33_v9  ;;  %v38_v15 = vcvt.s32.f32 %v34_v10  ;;  %v39_v16 = vcvt.s32.f32 %v35_v11  ;;  %172 = vmatpush.bf16.msra.mxu1 %v314_v20  ;;  %219 = vmatpush.bf16.msra.mxu2 %v316_v39  ;;  %v315_v40 = vld [vmem:[%s457_s4] sm:$0xff] }
   0x8   :  { %v42_v21 = vld [vmem:[#allocation2] sm:$0xff] }
   0x9   :  { %v40_v18 = vpack.c.bf16 %v37_v14, %v36_v13  ;;  %v41_v19 = vpack.c.bf16 %v39_v16, %v38_v15  ;;  %v43_v25 = vld [vmem:[#allocation2 + $0x8] sm:$0xff]  ;;  %v340_v42 = vld [vmem:[%s456_s3] ss:$0 sm:$0xff]  ;;  %s368_s3 = smov [#allocation3]  }
   0xa   :  { %112 = vmatpush.bf16.msra.mxu0 %v311_v3  ;;  %330 = vmatpush.bf16.msra.mxu3 %v311_v3  ;;  %v44_v24 = vld [vmem:[#allocation2 + $0x10] sm:$0xff]  ;;  %s244_s4 = sshll.u32 %s368_s3, 4  ;;  %s245_s4 = int_to_ptr.vmem [resolvable:$true] %s244_s4 }
   0xb   :  { %v45_v30 = vld [vmem:[#allocation2 + $0x18] sm:$0xff]  ;;  %220 = vmatpush.bf16.msra.mxu2 %v315_v40 }
   0xe   :  { %113 = vmatpush.bf16.msra.mxu0 %v310_v4  ;;  %331 = vmatpush.bf16.msra.mxu3 %v310_v4 }
  0x12   :  { %114 = vmatpush.bf16.msra.mxu0 %v309_v5  ;;  %332 = vmatpush.bf16.msra.mxu3 %v309_v5 }
  0x16   :  { %115 = vmatpush.bf16.msra.mxu0 %v308_v6  ;;  %333 = vmatpush.bf16.msra.mxu3 %v308_v6 }
  0x1a   :  { %116 = vmatpush.bf16.msra.mxu0 %v307_v12  ;;  %334 = vmatpush.bf16.msra.mxu3 %v307_v12 }
  0x1e   :  { %117 = vmatpush.bf16.msra.mxu0 %v306_v17  ;;  %335 = vmatpush.bf16.msra.mxu3 %v306_v17 }
  0x21   :  { %118 = vmatmul.bf16.vlgmr.msra.gmra.mxu0 %v40_v18  ;;  %123 = vmatmul.bf16.vlgmr.msra.gmra.mxu3 %v41_v19 }
  0x9e   :  { %v119_v22 = vpop.f32.mrf.mxu0 }
  0x9f   :  { %v129_v23 = vadd.f32 %v119_v22, %v42_v21 }
  0xa1   :  { %134 = vst.msk [vmem:[#allocation2] sm:$0xff] %vm26_vm0, %v129_v23 }
  0xa4   :  { %v124_v26 = vpop.f32.mrf.mxu3 }
  0xa5   :  { %v131_v27 = vadd.f32 %v124_v26, %v44_v24 }
  0xa6   :  { %v121_v28 = vpop.f32.mrf.mxu0 }
  0xa7   :  { %v130_v29 = vadd.f32 %v121_v28, %v43_v25  ;;  %136 = vst.msk [vmem:[#allocation2 + $0x10] sm:$0xff] %vm26_vm0, %v131_v27 }
  0xa8   :  { %v141_v33 = vld [vmem:[#allocation2] sm:$0xff] }
  0xa9   :  { %135 = vst.msk [vmem:[#allocation2 + $0x8] sm:$0xff] %vm26_vm0, %v130_v29 }
  0xac   :  { %v126_v31 = vpop.f32.mrf.mxu3 }
  0xad   :  { %v132_v32 = vadd.f32 %v126_v31, %v45_v30 }
  0xae   :  { %v143_v36 = vld [vmem:[#allocation2 + $0x10] sm:$0xff] }
  0xaf   :  { %137 = vst.msk [vmem:[#allocation2 + $0x18] sm:$0xff] %vm26_vm0, %v132_v32 }
  0xb0   :  { %v142_v34 = vld [vmem:[#allocation2 + $0x8] sm:$0xff] }
  0xb1   :  { %v145_v35 = vpack.c.bf16 %v142_v34, %v141_v33 }
  0xb3   :  { %294 = vmatmul.msk.bf16.vlgmr.msra.gmra.mxu1 %vm26_vm0, %v145_v35 }
  0xb6   :  { %v144_v37 = vld [vmem:[#allocation2 + $0x18] sm:$0xff] }
  0xb7   :  { %v146_v38 = vpack.c.bf16 %v144_v37, %v143_v36 }
  0xc3   :  { %295 = vmatmul.msk.bf16.gmra.mxu1 %vm26_vm0, %v146_v38 }
 0x130   :  { %v174_v41 = vpop.f32.mrf.mxu1 }
 0x131   :  { %v175_v43 = vadd.f32 %v340_v42, %v174_v41 }
 0x133   :  { %v184_v46 = vmax.f32 %v175_v43, 0.0 }
 0x138   :  { %v176_v44 = vpop.f32.mrf.mxu1 }
 0x139   :  { %v177_v45 = vadd.f32 %v340_v42, %v176_v44 }
 0x13b   :  { %v185_v47 = vmax.f32 %v177_v45, 0.0 }
 0x13d   :  { %v188_v48 = vpack.c.bf16 %v185_v47, %v184_v46 }
 0x13f   :  { %304 = vmatmul.msk.bf16.vlgmr.msra.gmra.mxu2 %vm206_vm1, %v188_v48 }
 0x140   :  { %v179_v49 = vpop.f32.mrf.mxu1 }
 0x141   :  { %v180_v50 = vadd.f32 %v340_v42, %v179_v49 }
 0x143   :  { %v186_v53 = vmax.f32 %v180_v50, 0.0 }
 0x148   :  { %v181_v51 = vpop.f32.mrf.mxu1 }
 0x149   :  { %v182_v52 = vadd.f32 %v340_v42, %v181_v51 }
 0x14b   :  { %v187_v54 = vmax.f32 %v182_v52, 0.0 }
 0x14d   :  { %v189_v55 = vpack.c.bf16 %v187_v54, %v186_v53 }
 0x14f   :  { %305 = vmatmul.msk.bf16.gmra.mxu2 %vm206_vm1, %v189_v55 }
 0x1c2   :  { %v222_v56 = vpop.f32.mrf.mxu2 }
 0x1ca   :  { %v224_v57 = vpop.f32.mrf.mxu2 }
 0x1cb   :  { %v320_v58 = vpack.c.bf16 %v224_v57, %v222_v56 }
 0x1cd   :  { %321 = vst [vmem:[#allocation3] sm:$0xff] %v320_v58  }
 0x1d2   :  { %v227_v59 = vpop.f32.mrf.mxu2 }
 0x1da   :  { %v229_v60 = vpop.f32.mrf.mxu2 }
 0x1db   :  { %v325_v61 = vpack.c.bf16 %v229_v60, %v227_v59 }
 0x1dd   :  { %327 = vst [vmem:[#allocation3 + $0x8] sm:$0xff] %v325_v61  }
 0x1de   :  { %252 = dma.vmem_to_hbm [thread:$0]  %s245_s4, 256, %s247_s18, [#allocation4], %s369_s19, %s369_s19, %s370_s20  }
 0x1df   :  { %365 = dma.done.wait [#allocation4], 256  }
 0x1e0   :  { %366 = vsyncadd [#allocation4], 4294967040 }
 0x1e1   :  { %257 = vsyncpa [#allocation4], 1 }

</bundles_post_ra>
